<compile_context>
chip_gen: v7x
topology: tpu7x:2x2x1
jax: 0.10.0
libtpu: 0.0.40
codegen_flags: <defaults>
</compile_context>

<pallas_src>
import functools
import math

import jax
import jax.numpy as jnp
from jax.experimental import pallas as pl
from jax.experimental.pallas import tpu as pltpu

NEG_SLOPE = 0.2      # LeakyReLU slope of the synthetic discriminator
_LANES = 128


def _round_up(x, m):
    return (x + m - 1) // m * m


def init_discriminator_params(key, in_features, hidden):
    k1, k2 = jax.random.split(key)
    w1 = jax.random.normal(k1, (in_features, hidden), jnp.float32) * 0.02
    b1 = jnp.zeros((1, hidden), jnp.float32)
    w2 = jax.random.normal(k2, (hidden, 1), jnp.float32) * 0.02
    b2 = jnp.zeros((1, 1), jnp.float32)
    return w1, b1, w2, b2


@functools.partial(jax.jit, static_argnames=("tb", "tk", "stream_dtype"))
def gradient_penalty(params, real, fake, eps, *, tb=128, tk=2048,
                     stream_dtype=jnp.bfloat16):
    """WGAN-GP gradient penalty.  real/fake: (B, C, H, W), eps: (B, 1, 1, 1)."""
    w1, b1, w2, _b2 = params          # b2 does not affect dD/dx -> never loaded
    B = real.shape[0]
    K = math.prod(real.shape[1:])
    H = w1.shape[1]

    sdt = jnp.dtype(stream_dtype)
    sub = 8 if sdt.itemsize == 4 else 16        # sublane quantum of the stream

    real_s = real.reshape(B, K).astype(sdt)
    fake_s = fake.reshape(B, K).astype(sdt)
    eps_f = eps.reshape(B, 1).astype(jnp.float32)

    # ---- tile sizes: sublane multiple of 8/16, lane multiple of 128 ----
    TB = min(_round_up(tb, sub), _round_up(B, sub))
    TK = min(_round_up(tk, _LANES), _round_up(K, _LANES))
    B_pad = _round_up(B, TB)
    K_pad = _round_up(K, TK)
    nb, nk = B_pad // TB, K_pad // TK

    # Zero-pad: padded K columns meet zero W1 rows (no effect on h); padded
    # batch rows produce garbage rows in the output slab that are simply never
    # read by the host-side reduction (no in-kernel masking needed).
    if B_pad != B or K_pad != K:
        real_s = jnp.pad(real_s, ((0, B_pad - B), (0, K_pad - K)))
        fake_s = jnp.pad(fake_s, ((0, B_pad - B), (0, K_pad - K)))
        eps_f = jnp.pad(eps_f, ((0, B_pad - B), (0, 0)))

    w1_f = w1.astype(jnp.float32)
    # Gram matrix of layer 1 (H x H): ||dh @ W1^T||^2 == dh @ G @ dh^T row-wise.
    g_f = w1_f.T @ w1_f
    if K_pad != K:
        w1_f = jnp.pad(w1_f, ((0, K_pad - K), (0, 0)))
    b1_f = b1.reshape(1, H).astype(jnp.float32)
    w2t_f = w2.reshape(1, H).astype(jnp.float32)      # W2^T

    def kernel(eps_ref, real_ref, fake_ref, w1_ref, b1_ref, w2t_ref, g_ref,
               out_ref, h_acc):
        # program_id only at the top level of the kernel body (never inside
        # pl.when closures) -- required for clean lowering everywhere.
        j = pl.program_id(1)

        @pl.when(j == 0)
        def _init():
            h_acc[...] = jnp.zeros_like(h_acc)

        # interpolation + forward pre-activation, accumulated over K tiles
        e = eps_ref[...]                                   # (TB, 1)  f32
        r = real_ref[...].astype(jnp.float32)              # (TB, TK)
        f = fake_ref[...].astype(jnp.float32)              # (TB, TK)
        interp = f + e * (r - f)                           # 3 VPU ops / element
        h_acc[...] += jnp.dot(interp, w1_ref[...],
                              preferred_element_type=jnp.float32)   # (TB, H)

        @pl.when(j == nk - 1)                              # nk is a static int
        def _finalize():
            h = h_acc[...] + b1_ref[...]                            # (TB, H)
            # dD/da with all-ones cotangent == LeakyReLU' * W2^T (no matmul)
            dh = jnp.where(h > 0, 1.0, NEG_SLOPE) * w2t_ref[...]    # (TB, H)
            # ||dh @ W1^T||^2 via the Gram form: K never re-enters the kernel.
            t = jnp.dot(dh, g_ref[...],
                        preferred_element_type=jnp.float32)         # (TB, H)
            ssq = jnp.sum(t * dh, axis=1, keepdims=True)            # (TB, 1)
            pen = (jnp.sqrt(ssq) - 1.0) ** 2                        # (TB, 1)
            # lane-dense output slab (avoids 1-lane masked stores)
            out_ref[...] = jnp.broadcast_to(pen, (TB, _LANES))

    partials = pl.pallas_call(
        kernel,
        out_shape=jax.ShapeDtypeStruct((B_pad, _LANES), jnp.float32),
        grid_spec=pltpu.PrefetchScalarGridSpec(
            num_scalar_prefetch=0,
            grid=(nb, nk),
            in_specs=[
                pl.BlockSpec((TB, 1), lambda i, j: (i, 0)),      # eps  (per batch tile)
                pl.BlockSpec((TB, TK), lambda i, j: (i, j)),     # real (streamed, bf16)
                pl.BlockSpec((TB, TK), lambda i, j: (i, j)),     # fake (streamed, bf16)
                pl.BlockSpec((TK, H), lambda i, j: (j, 0)),      # W1   (streamed over K)
                pl.BlockSpec((1, H), lambda i, j: (0, 0)),       # b1   (resident)
                pl.BlockSpec((1, H), lambda i, j: (0, 0)),       # W2^T (resident)
                pl.BlockSpec((H, H), lambda i, j: (0, 0)),       # G    (resident, HxH)
            ],
            out_specs=pl.BlockSpec((TB, _LANES), lambda i, j: (i, 0)),
            scratch_shapes=[pltpu.VMEM((TB, H), jnp.float32)],
        ),
        compiler_params=pltpu.CompilerParams(
            dimension_semantics=("parallel", "arbitrary"),
            vmem_limit_bytes=48 * 1024 * 1024,   # safe on v5e/v6e and v7x (64 MiB)
        ),
    )(eps_f, real_s, fake_s, w1_f, b1_f, w2t_f, g_f)

    # lane 0 of each *real* row holds that sample's (||g||-1)^2
    return jnp.sum(partials[:B, 0]) / B


# -------------------- pure-JAX reference (autodiff) --------------------
def _reference_penalty(params, real, fake, eps):
    w1, b1, w2, b2 = params
    b = real.shape[0]
    interp = eps * real + (1.0 - eps) * fake

    def d_fn(x):
        xf = x.reshape(b, -1)
        h = xf @ w1 + b1
        a = jnp.where(h > 0, h, NEG_SLOPE * h)
        return a @ w2 + b2

    y, vjp_fn = jax.vjp(d_fn, interp)
    (grads,) = vjp_fn(jnp.ones_like(y))
    grads = grads.reshape(b, -1)
    return jnp.mean((jnp.linalg.norm(grads, axis=1) - 1.0) ** 2)


if __name__ == "__main__":
    key = jax.random.PRNGKey(0)
    (k_real, k_fake, k_eps, k_params,
     k2_real, k2_fake, k2_eps, k2_params) = jax.random.split(key, 8)

    # ---- primary small test (B=2, C=4, 16x16, hidden=32) ----
    B, C, Hs, Ws = 2, 4, 16, 16
    HIDDEN = 32
    K = C * Hs * Ws

    real = jax.random.normal(k_real, (B, C, Hs, Ws), jnp.float32)
    fake = jax.random.normal(k_fake, (B, C, Hs, Ws), jnp.float32)
    # eps ~ U[0,1) per sample, mirrors np.random.random((B,1,1,1))
    eps = jax.random.uniform(k_eps, (B, 1, 1, 1), jnp.float32)
    params = init_discriminator_params(k_params, K, HIDDEN)

    out = jax.block_until_ready(gradient_penalty(params, real, fake, eps))

    # matched-precision reference (same bf16-rounded streams as the kernel)
    real_q = real.astype(jnp.bfloat16).astype(jnp.float32)
    fake_q = fake.astype(jnp.bfloat16).astype(jnp.float32)
    ref_q = _reference_penalty(params, real_q, fake_q, eps)
    ref_f32 = _reference_penalty(params, real, fake, eps)

    assert jnp.isfinite(out), "non-finite gradient penalty"
    assert jnp.allclose(out, ref_q, rtol=1e-3, atol=1e-4), (out, ref_q)
    # bf16 streaming only perturbs the inputs; stays close to the pure-f32 path
    assert jnp.allclose(out, ref_f32, rtol=5e-2, atol=1e-3), (out, ref_f32)

    # ---- second test: exercises batch/K padding and multi-tile K accumulation ----
    B2, C2, H2, W2 = 5, 3, 20, 20
    K2 = C2 * H2 * W2
    real2 = jax.random.normal(k2_real, (B2, C2, H2, W2), jnp.float32)
    fake2 = jax.random.normal(k2_fake, (B2, C2, H2, W2), jnp.float32)
    eps2 = jax.random.uniform(k2_eps, (B2, 1, 1, 1), jnp.float32)
    params2 = init_discriminator_params(k2_params, K2, HIDDEN)

    out2 = jax.block_until_ready(
        gradient_penalty(params2, real2, fake2, eps2, tk=128))
    ref2_q = _reference_penalty(
        params2,
        real2.astype(jnp.bfloat16).astype(jnp.float32),
        fake2.astype(jnp.bfloat16).astype(jnp.float32),
        eps2)
    assert jnp.isfinite(out2), "non-finite gradient penalty (test 2)"
    assert jnp.allclose(out2, ref2_q, rtol=1e-3, atol=1e-4), (out2, ref2_q)

    print("KERNEL_OK")
</pallas_src>

<mosaic_0001>
module attributes {stable_mosaic.version = 11 : i64} {
  func.func @kernel(%arg0: i32, %arg1: i32, %arg2: memref<16x1xf32, #tpu.memory_space<vmem>>, %arg3: memref<16x1024xbf16, #tpu.memory_space<vmem>>, %arg4: memref<16x1024xbf16, #tpu.memory_space<vmem>>, %arg5: memref<1024x32xf32, #tpu.memory_space<vmem>>, %arg6: memref<1x32xf32, #tpu.memory_space<vmem>>, %arg7: memref<1x32xf32, #tpu.memory_space<vmem>>, %arg8: memref<32x32xf32, #tpu.memory_space<vmem>>, %arg9: memref<16x128xf32, #tpu.memory_space<vmem>>, %arg10: memref<16x32xf32, #tpu.memory_space<vmem>>) attributes {dimension_semantics = [#tpu.dimension_semantics<parallel>, #tpu.dimension_semantics<arbitrary>], iteration_bounds = array<i64: 1, 1>, scalar_prefetch = 0 : i64, scratch_operands = 1 : i64, tpu.core_type = #tpu.core_type<tc>, window_params = [{transform_indices = @transform_0, window_bounds = array<i64: 16, 1>}, {transform_indices = @transform_1, window_bounds = array<i64: 16, 1024>}, {transform_indices = @transform_2, window_bounds = array<i64: 16, 1024>}, {transform_indices = @transform_3, window_bounds = array<i64: 1024, 32>}, {pipeline_mode = #tpu.pipeline_mode<synchronous>, transform_indices = @transform_4, window_bounds = array<i64: 1, 32>}, {pipeline_mode = #tpu.pipeline_mode<synchronous>, transform_indices = @transform_5, window_bounds = array<i64: 1, 32>}, {pipeline_mode = #tpu.pipeline_mode<synchronous>, transform_indices = @transform_6, window_bounds = array<i64: 32, 32>}, {transform_indices = @transform_7, window_bounds = array<i64: 16, 128>}]} {
    %c0_i32 = arith.constant 0 : i32
    %0 = arith.cmpi eq, %arg1, %c0_i32 : i32
    %1 = arith.extui %0 : i1 to i32
    %c0_i32_0 = arith.constant 0 : i32
    %2 = arith.cmpi ne, %1, %c0_i32_0 : i32
    scf.if %2 {
      %cst_14 = arith.constant 0.000000e+00 : f32
      %20 = vector.broadcast %cst_14 : f32 to vector<16x32xf32>
      %c0_15 = arith.constant 0 : index
      %c0_16 = arith.constant 0 : index
      %21 = vector.load %arg10[%c0_15, %c0_16] : memref<16x32xf32, #tpu.memory_space<vmem>>, vector<16x32xf32>
      tpu.vector_store %arg10[%c0_15, %c0_16], %20 {strides = array<i32>} : memref<16x32xf32, #tpu.memory_space<vmem>>, vector<16x32xf32>,
    } else {
    }
    %c0 = arith.constant 0 : index
    %c0_1 = arith.constant 0 : index
    %3 = vector.load %arg2[%c0, %c0_1] : memref<16x1xf32, #tpu.memory_space<vmem>>, vector<16x1xf32>
    %c0_2 = arith.constant 0 : index
    %c0_3 = arith.constant 0 : index
    %4 = vector.load %arg3[%c0_2, %c0_3] : memref<16x1024xbf16, #tpu.memory_space<vmem>>, vector<16x1024xbf16>
    %5 = arith.extf %4 : vector<16x1024xbf16> to vector<16x1024xf32>
    %c0_4 = arith.constant 0 : index
    %c0_5 = arith.constant 0 : index
    %6 = vector.load %arg4[%c0_4, %c0_5] : memref<16x1024xbf16, #tpu.memory_space<vmem>>, vector<16x1024xbf16>
    %7 = arith.extf %6 : vector<16x1024xbf16> to vector<16x1024xf32>
    %8 = arith.subf %5, %7 : vector<16x1024xf32>
    %9 = vector.broadcast %3 : vector<16x1xf32> to vector<16x1024xf32>
    %10 = arith.mulf %9, %8 : vector<16x1024xf32>
    %11 = arith.addf %7, %10 : vector<16x1024xf32>
    %c0_6 = arith.constant 0 : index
    %c0_7 = arith.constant 0 : index
    %12 = vector.load %arg10[%c0_6, %c0_7] : memref<16x32xf32, #tpu.memory_space<vmem>>, vector<16x32xf32>
    %c0_8 = arith.constant 0 : index
    %c0_9 = arith.constant 0 : index
    %13 = vector.load %arg5[%c0_8, %c0_9] : memref<1024x32xf32, #tpu.memory_space<vmem>>, vector<1024x32xf32>
    %cst = arith.constant dense<0.000000e+00> : vector<16x32xf32>
    %14 = tpu.matmul %11, %13, %cst {dimension_numbers = #tpu.dot_dimension_numbers<[1], [0], [0], [1], [0, 0, 1, 1], [], []>} : vector<16x1024xf32>, vector<1024x32xf32>, vector<16x32xf32> -> vector<16x32xf32>
    %15 = arith.addf %12, %14 : vector<16x32xf32>
    %c0_10 = arith.constant 0 : index
    %c0_11 = arith.constant 0 : index
    %16 = vector.load %arg10[%c0_10, %c0_11] : memref<16x32xf32, #tpu.memory_space<vmem>>, vector<16x32xf32>
    tpu.vector_store %arg10[%c0_10, %c0_11], %15 {strides = array<i32>} : memref<16x32xf32, #tpu.memory_space<vmem>>, vector<16x32xf32>,
    %c0_i32_12 = arith.constant 0 : i32
    %17 = arith.cmpi eq, %arg1, %c0_i32_12 : i32
    %18 = arith.extui %17 : i1 to i32
    %c0_i32_13 = arith.constant 0 : i32
    %19 = arith.cmpi ne, %18, %c0_i32_13 : i32
    scf.if %19 {
      %c0_14 = arith.constant 0 : index
      %c0_15 = arith.constant 0 : index
      %20 = vector.load %arg10[%c0_14, %c0_15] : memref<16x32xf32, #tpu.memory_space<vmem>>, vector<16x32xf32>
      %c0_16 = arith.constant 0 : index
      %c0_17 = arith.constant 0 : index
      %21 = vector.load %arg6[%c0_16, %c0_17] : memref<1x32xf32, #tpu.memory_space<vmem>>, vector<1x32xf32>
      %22 = vector.broadcast %21 : vector<1x32xf32> to vector<16x32xf32>
      %23 = arith.addf %20, %22 : vector<16x32xf32>
      %cst_18 = arith.constant 0.000000e+00 : f32
      %24 = vector.broadcast %cst_18 : f32 to vector<16x32xf32>
      %25 = arith.cmpf ogt, %23, %24 : vector<16x32xf32>
      %cst_19 = arith.constant 1.000000e+00 : f32
      %cst_20 = arith.constant 2.000000e-01 : f32
      %26 = vector.broadcast %cst_19 : f32 to vector<16x32xf32>
      %27 = vector.broadcast %cst_20 : f32 to vector<16x32xf32>
      %28 = arith.select %25, %26, %27 : vector<16x32xi1>, vector<16x32xf32>
      %c0_21 = arith.constant 0 : index
      %c0_22 = arith.constant 0 : index
      %29 = vector.load %arg7[%c0_21, %c0_22] : memref<1x32xf32, #tpu.memory_space<vmem>>, vector<1x32xf32>
      %30 = vector.broadcast %29 : vector<1x32xf32> to vector<16x32xf32>
      %31 = arith.mulf %28, %30 : vector<16x32xf32>
      %c0_23 = arith.constant 0 : index
      %c0_24 = arith.constant 0 : index
      %32 = vector.load %arg8[%c0_23, %c0_24] : memref<32x32xf32, #tpu.memory_space<vmem>>, vector<32x32xf32>
      %cst_25 = arith.constant dense<0.000000e+00> : vector<16x32xf32>
      %33 = tpu.matmul %31, %32, %cst_25 {dimension_numbers = #tpu.dot_dimension_numbers<[1], [0], [0], [1], [0, 0, 1, 1], [], []>} : vector<16x32xf32>, vector<32x32xf32>, vector<16x32xf32> -> vector<16x32xf32>
      %34 = arith.mulf %33, %31 : vector<16x32xf32>
      %cst_26 = arith.constant dense<0.000000e+00> : vector<16xf32>
      %35 = vector.multi_reduction <add>, %34, %cst_26 [1] : vector<16x32xf32> to vector<16xf32>
      %36 = vector.shape_cast %35 : vector<16xf32> to vector<16x1xf32>
      %37 = math.sqrt %36 : vector<16x1xf32>
      %cst_27 = arith.constant 1.000000e+00 : f32
      %38 = vector.broadcast %cst_27 : f32 to vector<16x1xf32>
      %39 = arith.subf %37, %38 : vector<16x1xf32>
      %40 = arith.mulf %39, %39 : vector<16x1xf32>
      %41 = vector.shape_cast %40 : vector<16x1xf32> to vector<16x1xf32>
      %42 = vector.broadcast %41 : vector<16x1xf32> to vector<16x128xf32>
      %c0_28 = arith.constant 0 : index
      %c0_29 = arith.constant 0 : index
      %43 = vector.load %arg9[%c0_28, %c0_29] : memref<16x128xf32, #tpu.memory_space<vmem>>, vector<16x128xf32>
      tpu.vector_store %arg9[%c0_28, %c0_29], %42 {strides = array<i32>} : memref<16x128xf32, #tpu.memory_space<vmem>>, vector<16x128xf32>,
    } else {
    }
    return
  }
  func.func @transform_0(%arg0: i32, %arg1: i32) -> (i32, i32) {
    %c0_i32 = arith.constant 0 : i32
    %c0_i32_0 = arith.constant 0 : i32
    return %arg0, %c0_i32 : i32, i32
  }
  func.func @transform_1(%arg0: i32, %arg1: i32) -> (i32, i32) {
    %c0_i32 = arith.constant 0 : i32
    return %arg0, %arg1 : i32, i32
  }
  func.func @transform_2(%arg0: i32, %arg1: i32) -> (i32, i32) {
    %c0_i32 = arith.constant 0 : i32
    return %arg0, %arg1 : i32, i32
  }
  func.func @transform_3(%arg0: i32, %arg1: i32) -> (i32, i32) {
    %c0_i32 = arith.constant 0 : i32
    %c0_i32_0 = arith.constant 0 : i32
    return %arg1, %c0_i32 : i32, i32
  }
  func.func @transform_4(%arg0: i32, %arg1: i32) -> (i32, i32) {
    %c0_i32 = arith.constant 0 : i32
    %c0_i32_0 = arith.constant 0 : i32
    %c0_i32_1 = arith.constant 0 : i32
    return %c0_i32, %c0_i32_0 : i32, i32
  }
  func.func @transform_5(%arg0: i32, %arg1: i32) -> (i32, i32) {
    %c0_i32 = arith.constant 0 : i32
    %c0_i32_0 = arith.constant 0 : i32
    %c0_i32_1 = arith.constant 0 : i32
    return %c0_i32, %c0_i32_0 : i32, i32
  }
  func.func @transform_6(%arg0: i32, %arg1: i32) -> (i32, i32) {
    %c0_i32 = arith.constant 0 : i32
    %c0_i32_0 = arith.constant 0 : i32
    %c0_i32_1 = arith.constant 0 : i32
    return %c0_i32, %c0_i32_0 : i32, i32
  }
  func.func @transform_7(%arg0: i32, %arg1: i32) -> (i32, i32) {
    %c0_i32 = arith.constant 0 : i32
    %c0_i32_0 = arith.constant 0 : i32
    return %arg0, %c0_i32 : i32, i32
  }
}

</mosaic_0001>

<bundles_post_ra>
// kernel: gradient_penalty.1
= control target key start
LH: loop header
LB: loop body
LE: loop exit
PB: predicated region body
PF: predicated region fallthrough
CT: control target
= control target key end

     0   :  { %v1039_v0 = vmov 0   ;;  %vm30_vm0 = vcmask 261120   ;;  %s1620_s0 = inlined_call_operand.vmem [shape: f32[16,1], index: 0, kind: input, shape index: {}]   ;;  %s1621_s3 = inlined_call_operand.vmem [shape: f32[1024,32], index: 3, kind: input, shape index: {}]   ;;  %s1622_s1 = inlined_call_operand.vmem [shape: bf16[16,1024], index: 1, kind: input, shape index: {}]   ;;  %s1623_s2 = inlined_call_operand.vmem [shape: bf16[16,1024], index: 2, kind: input, shape index: {}]   ;;  %s1624_s6 = inlined_call_operand.vmem [shape: f32[32,32], index: 6, kind: input, shape index: {}]   ;;  %s1625_s4 = inlined_call_operand.vmem [shape: f32[1,32], index: 4, kind: input, shape index: {}]   ;;  %s1626_s5 = inlined_call_operand.vmem [shape: f32[1,32], index: 5, kind: input, shape index: {}]   ;;  %s1627_s7 = inlined_call_operand.vmem [shape: f32[16,128], index: 7, kind: output, shape index: {}]  }
   0x1   :  { %1034 = vset.pattern.permute.xlu0 %v1039_v0  ;;  %v33_v1 = vld [vmem:[%s1620_s0] sm:$0xff]  ;;  %v34_v2 = vld [vmem:[%s1620_s0 + $0x8] sm:$0xff]  ;;  %v161_v14 = vld [vmem:[%s1621_s3 + $0x90] sm:$0xff] }
   0x2   :  { %v159_v3 = vld [vmem:[%s1621_s3 + $0x80] sm:$0xff]  ;;  %101 = vperm.xlu0 %1034, %v33_v1   ;;  %v160_v4 = vld [vmem:[%s1621_s3 + $0x88] sm:$0xff]  ;;  %v162_v15 = vld [vmem:[%s1621_s3 + $0x98] sm:$0xff] }
   0x3   :  { %v191_v5 = vld [vmem:[%s1621_s3 + $0x180] sm:$0xff]  ;;  %v192_v6 = vld [vmem:[%s1621_s3 + $0x188] sm:$0xff]  ;;  %v895_v7 = vpack.c.bf16 %v160_v4, %v159_v3  ;;  %v899_v17 = vpack.c.bf16 %v162_v15, %v161_v14  ;;  %v193_v18 = vld [vmem:[%s1621_s3 + $0x190] sm:$0xff] }
   0x4   :  { %v927_v8 = vpack.c.bf16 %v192_v6, %v191_v5  ;;  %v143_v9 = vld [vmem:[%s1621_s3] sm:$0xff]  ;;  %v144_v10 = vld [vmem:[%s1621_s3 + $0x8] sm:$0xff]  ;;  %v194_v19 = vld [vmem:[%s1621_s3 + $0x198] sm:$0xff] }
   0x5   :  { %v175_v11 = vld [vmem:[%s1621_s3 + $0x100] sm:$0xff]  ;;  %v897_v12 = vpack.c.bf16 %v144_v10, %v143_v9  ;;  %v176_v13 = vld [vmem:[%s1621_s3 + $0x108] sm:$0xff]  ;;  %896 = vmatprep.subr.bf16.mxu0 %v895_v7  ;;  %v145_v20 = vld [vmem:[%s1621_s3 + $0x10] sm:$0xff]  ;;  %v931_v21 = vpack.c.bf16 %v194_v19, %v193_v18 }
   0x6   :  { %928 = vmatprep.subr.bf16.mxu1 %v927_v8  ;;  %v929_v16 = vpack.c.bf16 %v176_v13, %v175_v11  ;;  %106 = vperm.xlu0 %1034, %v34_v2   ;;  %v146_v22 = vld [vmem:[%s1621_s3 + $0x18] sm:$0xff]  ;;  %v177_v23 = vld [vmem:[%s1621_s3 + $0x110] sm:$0xff]  ;;  %v163_v27 = vld [vmem:[%s1621_s3 + $0xa0] sm:$0xff] }
   0x7   :  { %898 = vmatpush3.bf16.msra.mxu0 %v897_v12  ;;  %v178_v24 = vld [vmem:[%s1621_s3 + $0x118] sm:$0xff]  ;;  %v901_v25 = vpack.c.bf16 %v146_v22, %v145_v20  ;;  %v164_v28 = vld [vmem:[%s1621_s3 + $0xa8] sm:$0xff]  ;;  %v195_v29 = vld [vmem:[%s1621_s3 + $0x1a0] sm:$0xff] }
   0x8   :  { %930 = vmatpush3.bf16.msra.mxu1 %v929_v16  ;;  %900 = vmatprep.subr.bf16.mxu0 %v899_v17  ;;  %v933_v26 = vpack.c.bf16 %v178_v24, %v177_v23  ;;  %v903_v30 = vpack.c.bf16 %v164_v28, %v163_v27  ;;  %v196_v31 = vld [vmem:[%s1621_s3 + $0x1a8] sm:$0xff]  ;;  %v147_v32 = vld [vmem:[%s1621_s3 + $0x20] sm:$0xff]  ;;  %v165_v37 = vld [vmem:[%s1621_s3 + $0xb0] sm:$0xff] }
   0x9   :  { %932 = vmatprep.subr.bf16.mxu1 %v931_v21  ;;  %v148_v33 = vld [vmem:[%s1621_s3 + $0x28] sm:$0xff]  ;;  %v935_v34 = vpack.c.bf16 %v196_v31, %v195_v29  ;;  %v179_v35 = vld [vmem:[%s1621_s3 + $0x120] sm:$0xff]  ;;  %v166_v39 = vld [vmem:[%s1621_s3 + $0xb8] sm:$0xff] }
   0xa   :  { %v180_v36 = vld [vmem:[%s1621_s3 + $0x128] sm:$0xff]  ;;  %v905_v38 = vpack.c.bf16 %v148_v33, %v147_v32  ;;  %v197_v40 = vld [vmem:[%s1621_s3 + $0x1b0] sm:$0xff]  ;;  %v198_v41 = vld [vmem:[%s1621_s3 + $0x1b8] sm:$0xff]  ;;  %v907_v43 = vpack.c.bf16 %v166_v39, %v165_v37 }
   0xb   :  { %902 = vmatpush3.bf16.msra.mxu0 %v901_v25  ;;  %v937_v42 = vpack.c.bf16 %v180_v36, %v179_v35  ;;  %v149_v44 = vld [vmem:[%s1621_s3 + $0x30] sm:$0xff]  ;;  %v150_v45 = vld [vmem:[%s1621_s3 + $0x38] sm:$0xff]  ;;  %v939_v47 = vpack.c.bf16 %v198_v41, %v197_v40  ;;  %v167_v49 = vld [vmem:[%s1621_s3 + $0xc0] sm:$0xff] }
   0xc   :  { %934 = vmatpush3.bf16.msra.mxu1 %v933_v26  ;;  %904 = vmatprep.subr.bf16.mxu0 %v903_v30  ;;  %v181_v46 = vld [vmem:[%s1621_s3 + $0x130] sm:$0xff]  ;;  %v182_v48 = vld [vmem:[%s1621_s3 + $0x138] sm:$0xff]  ;;  %v168_v50 = vld [vmem:[%s1621_s3 + $0xc8] sm:$0xff]  ;;  %v909_v53 = vpack.c.bf16 %v150_v45, %v149_v44 }
   0xd   :  { %936 = vmatprep.subr.bf16.mxu1 %v935_v34  ;;  %v199_v51 = vld [vmem:[%s1621_s3 + $0x1c0] sm:$0xff]  ;;  %v200_v52 = vld [vmem:[%s1621_s3 + $0x1c8] sm:$0xff]  ;;  %v941_v54 = vpack.c.bf16 %v182_v48, %v181_v46  ;;  %v911_v55 = vpack.c.bf16 %v168_v50, %v167_v49  ;;  %v169_v61 = vld [vmem:[%s1621_s3 + $0xd0] sm:$0xff] }
   0xe   :  { %v151_v56 = vld [vmem:[%s1621_s3 + $0x40] sm:$0xff]  ;;  %v152_v57 = vld [vmem:[%s1621_s3 + $0x48] sm:$0xff]  ;;  %v943_v59 = vpack.c.bf16 %v200_v52, %v199_v51  ;;  %v170_v62 = vld [vmem:[%s1621_s3 + $0xd8] sm:$0xff] }
   0xf   :  { %906 = vmatpush3.bf16.msra.mxu0 %v905_v38  ;;  %v183_v58 = vld [vmem:[%s1621_s3 + $0x140] sm:$0xff]  ;;  %v184_v60 = vld [vmem:[%s1621_s3 + $0x148] sm:$0xff]  ;;  %v201_v63 = vld [vmem:[%s1621_s3 + $0x1d0] sm:$0xff]  ;;  %v913_v1 = vpack.c.bf16 %v152_v57, %v151_v56  ;;  %v915_v3 = vpack.c.bf16 %v170_v62, %v169_v61 }
  0x10   :  { %938 = vmatpush3.bf16.msra.mxu1 %v937_v42  ;;  %908 = vmatprep.subr.bf16.mxu0 %v907_v43  ;;  %v202_v0 = vld [vmem:[%s1621_s3 + $0x1d8] sm:$0xff]  ;;  %v945_v2 = vpack.c.bf16 %v184_v60, %v183_v58  ;;  %v153_v4 = vld [vmem:[%s1621_s3 + $0x50] sm:$0xff]  ;;  %v171_v9 = vld [vmem:[%s1621_s3 + $0xe0] sm:$0xff] }
  0x11   :  { %940 = vmatprep.subr.bf16.mxu1 %v939_v47  ;;  %v154_v5 = vld [vmem:[%s1621_s3 + $0x58] sm:$0xff]  ;;  %v185_v6 = vld [vmem:[%s1621_s3 + $0x150] sm:$0xff]  ;;  %v947_v7 = vpack.c.bf16 %v202_v0, %v201_v63  ;;  %v172_v10 = vld [vmem:[%s1621_s3 + $0xe8] sm:$0xff] }
  0x12   :  { %v186_v8 = vld [vmem:[%s1621_s3 + $0x158] sm:$0xff]  ;;  %v203_v11 = vld [vmem:[%s1621_s3 + $0x1e0] sm:$0xff]  ;;  %v204_v12 = vld [vmem:[%s1621_s3 + $0x1e8] sm:$0xff]  ;;  %v917_v13 = vpack.c.bf16 %v154_v5, %v153_v4  ;;  %v919_v15 = vpack.c.bf16 %v172_v10, %v171_v9 }
  0x13   :  { %910 = vmatpush3.bf16.msra.mxu0 %v909_v53  ;;  %v949_v14 = vpack.c.bf16 %v186_v8, %v185_v6  ;;  %v155_v16 = vld [vmem:[%s1621_s3 + $0x60] sm:$0xff]  ;;  %v156_v17 = vld [vmem:[%s1621_s3 + $0x68] sm:$0xff]  ;;  %v951_v19 = vpack.c.bf16 %v204_v12, %v203_v11  ;;  %v173_v21 = vld [vmem:[%s1621_s3 + $0xf0] sm:$0xff] }
  0x14   :  { %942 = vmatpush3.bf16.msra.mxu1 %v941_v54  ;;  %912 = vmatprep.subr.bf16.mxu0 %v911_v55  ;;  %v187_v18 = vld [vmem:[%s1621_s3 + $0x160] sm:$0xff]  ;;  %v188_v20 = vld [vmem:[%s1621_s3 + $0x168] sm:$0xff]  ;;  %v174_v22 = vld [vmem:[%s1621_s3 + $0xf8] sm:$0xff]  ;;  %v921_v25 = vpack.c.bf16 %v156_v17, %v155_v16 }
  0x15   :  { %944 = vmatprep.subr.bf16.mxu1 %v943_v59  ;;  %v205_v23 = vld [vmem:[%s1621_s3 + $0x1f0] sm:$0xff]  ;;  %v206_v24 = vld [vmem:[%s1621_s3 + $0x1f8] sm:$0xff]  ;;  %v953_v26 = vpack.c.bf16 %v188_v20, %v187_v18  ;;  %v923_v27 = vpack.c.bf16 %v174_v22, %v173_v21  ;;  %v223_v33 = vld [vmem:[%s1621_s3 + $0x280] sm:$0xff] }
  0x16   :  { %v157_v28 = vld [vmem:[%s1621_s3 + $0x70] sm:$0xff]  ;;  %v158_v29 = vld [vmem:[%s1621_s3 + $0x78] sm:$0xff]  ;;  %v955_v31 = vpack.c.bf16 %v206_v24, %v205_v23  ;;  %v224_v34 = vld [vmem:[%s1621_s3 + $0x288] sm:$0xff] }
  0x17   :  { %914 = vmatpush3.bf16.msra.mxu0 %v913_v1  ;;  %v189_v30 = vld [vmem:[%s1621_s3 + $0x170] sm:$0xff]  ;;  %v190_v32 = vld [vmem:[%s1621_s3 + $0x178] sm:$0xff]  ;;  %v255_v35 = vld [vmem:[%s1621_s3 + $0x380] sm:$0xff]  ;;  %v925_v37 = vpack.c.bf16 %v158_v29, %v157_v28  ;;  %v959_v39 = vpack.c.bf16 %v224_v34, %v223_v33 }
  0x18   :  { %946 = vmatpush3.bf16.msra.mxu1 %v945_v2  ;;  %916 = vmatprep.subr.bf16.mxu0 %v915_v3  ;;  %v256_v36 = vld [vmem:[%s1621_s3 + $0x388] sm:$0xff]  ;;  %v957_v38 = vpack.c.bf16 %v190_v32, %v189_v30  ;;  %v35_v41 = vld [vmem:[%s1622_s1] sm:$0xff]  ;;  %v1327_v57 = vld [vmem:[%s1622_s1 + $0x10] sm:$0xff] }
  0x19   :  { %948 = vmatprep.subr.bf16.mxu1 %v947_v7  ;;  %v991_v40 = vpack.c.bf16 %v256_v36, %v255_v35  ;;  %v1298_v42 = vld [vmem:[%s1623_s2] sm:$0xff]  ;;  %v36_v43 = vld [vmem:[%s1622_s1 + $0x8] sm:$0xff]  ;;  %v43_v45 = vunpack.c.l.bf16 %v35_v41  ;;  %v44_v46 = vunpack.c.h.bf16 %v35_v41  ;;  %v1333_v62 = vld [vmem:[%s1623_s2 + $0x10] sm:$0xff]  ;;  %v48_v12 = vunpack.c.h.bf16 %v1327_v57 }
  0x1a   :  { %v60_v44 = vld [vmem:[%s1623_s2 + $0x8] sm:$0xff]  ;;  %v67_v47 = vunpack.c.l.bf16 %v1298_v42  ;;  %v68_v48 = vunpack.c.h.bf16 %v1298_v42  ;;  %v39_v49 = vld [vmem:[%s1622_s1 + $0x20] sm:$0xff]  ;;  %v45_v51 = vunpack.c.l.bf16 %v36_v43  ;;  %v46_v52 = vunpack.c.h.bf16 %v36_v43  ;;  %v1338_v63 = vld [vmem:[%s1622_s1 + $0x18] sm:$0xff] }
  0x1b   :  { %918 = vmatpush3.bf16.msra.mxu0 %v917_v13  ;;  %v1314_v50 = vld [vmem:[%s1623_s2 + $0x20] sm:$0xff]  ;;  %v69_v53 = vunpack.c.l.bf16 %v60_v44  ;;  %v70_v54 = vunpack.c.h.bf16 %v60_v44  ;;  %v40_v55 = vld [vmem:[%s1622_s1 + $0x28] sm:$0xff]  ;;  %v52_v60 = vunpack.c.h.bf16 %v39_v49  ;;  %v1343_v0 = vld [vmem:[%s1623_s2 + $0x18] sm:$0xff]  ;;  %v51_v3 = vunpack.c.l.bf16 %v39_v49 }
  0x1c   :  { %950 = vmatpush3.bf16.msra.mxu1 %v949_v14  ;;  %920 = vmatprep.subr.bf16.mxu0 %v919_v15  ;;  %v1322_v56 = vld [vmem:[%s1623_s2 + $0x28] sm:$0xff]  ;;  %v83_v58 = vsub.f32 %v43_v45, %v67_v47  ;;  %v84_v59 = vsub.f32 %v44_v46, %v68_v48  ;;  %v76_v61 = vunpack.c.h.bf16 %v1314_v50  ;;  %v54_v1 = vunpack.c.h.bf16 %v40_v55  ;;  %v207_v7 = vld [vmem:[%s1621_s3 + $0x200] sm:$0xff]  ;;  %v225_v17 = vld [vmem:[%s1621_s3 + $0x290] sm:$0xff] }
  0x1d   :  { %952 = vmatprep.subr.bf16.mxu1 %v951_v19  ;;  %v78_v2 = vunpack.c.h.bf16 %v1322_v56  ;;  %v75_v4 = vunpack.c.l.bf16 %v1314_v50  ;;  %v85_v5 = vsub.f32 %v45_v51, %v69_v53  ;;  %v86_v6 = vsub.f32 %v46_v52, %v70_v54  ;;  %v208_v8 = vld [vmem:[%s1621_s3 + $0x208] sm:$0xff]  ;;  %v239_v11 = vld [vmem:[%s1621_s3 + $0x300] sm:$0xff]  ;;  %v226_v18 = vld [vmem:[%s1621_s3 + $0x298] sm:$0xff] }
  0x1e   :  { %v53_v9 = vunpack.c.l.bf16 %v40_v55  ;;  %v77_v10 = vunpack.c.l.bf16 %v1322_v56  ;;  %v72_v13 = vunpack.c.h.bf16 %v1333_v62  ;;  %v50_v14 = vunpack.c.h.bf16 %v1338_v63  ;;  %v240_v16 = vld [vmem:[%s1621_s3 + $0x308] sm:$0xff]  ;;  %v257_v23 = vld [vmem:[%s1621_s3 + $0x390] sm:$0xff]  ;;  %v258_v24 = vld [vmem:[%s1621_s3 + $0x398] sm:$0xff] }
  0x1f   :  { %922 = vmatpush3.bf16.msra.mxu0 %v921_v25  ;;  %v74_v15 = vunpack.c.h.bf16 %v1343_v0  ;;  %v961_v20 = vpack.c.bf16 %v208_v8, %v207_v7  ;;  %v92_v21 = vsub.f32 %v52_v60, %v76_v61  ;;  %v94_v22 = vsub.f32 %v54_v1, %v78_v2  ;;  %v241_v32 = vld [vmem:[%s1621_s3 + $0x310] sm:$0xff]  ;;  %v242_v33 = vld [vmem:[%s1621_s3 + $0x318] sm:$0xff]  ;;  %v228_v55 = vld [vmem:[%s1621_s3 + $0x2a8] sm:$0xff] }
  0x20   :  { %954 = vmatpush3.bf16.msra.mxu1 %v953_v26  ;;  %924 = vmatprep.subr.bf16.mxu0 %v923_v27  ;;  %v91_v25 = vsub.f32 %v51_v3, %v75_v4  ;;  %v209_v26 = vld [vmem:[%s1621_s3 + $0x210] sm:$0xff]  ;;  %v993_v34 = vpack.c.bf16 %v240_v16, %v239_v11  ;;  %v93_v35 = vsub.f32 %v53_v9, %v77_v10  ;;  %v259_v56 = vld [vmem:[%s1621_s3 + $0x3a0] sm:$0xff]  ;;  %v244_v50 = vld [vmem:[%s1621_s3 + $0x328] sm:$0xff] }
  0x21   :  { %956 = vmatprep.subr.bf16.mxu1 %v955_v31  ;;  %v210_v31 = vld [vmem:[%s1621_s3 + $0x218] sm:$0xff]  ;;  %v88_v36 = vsub.f32 %v48_v12, %v72_v13  ;;  %v963_v43 = vpack.c.bf16 %v226_v18, %v225_v17  ;;  %v995_v44 = vpack.c.bf16 %v258_v24, %v257_v23  ;;  %v997_v46 = vpack.c.bf16 %v242_v33, %v241_v32  ;;  %v211_v3 = vld [vmem:[%s1621_s3 + $0x220] sm:$0xff]  ;;  %v261_v9 = vld [vmem:[%s1621_s3 + $0x3b0] sm:$0xff] }
  0x22   :  { %v965_v45 = vpack.c.bf16 %v210_v31, %v209_v26  ;;  %v243_v7 = vld [vmem:[%s1621_s3 + $0x320] sm:$0xff]  ;;  %v230_v8 = vld [vmem:[%s1621_s3 + $0x2b8] sm:$0xff]  ;;  %v213_v17 = vld [vmem:[%s1621_s3 + $0x230] sm:$0xff] }
  0x23   :  { %926 = vmatpush3.bf16.msra.mxu0 %v925_v37  ;;  %v90_v37 = vsub.f32 %v50_v14, %v74_v15  ;;  %v1001_v16 = vpack.c.bf16 %v244_v50, %v243_v7  ;;  %v214_v18 = vld [vmem:[%s1621_s3 + $0x238] sm:$0xff]  ;;  %v232_v23 = vld [vmem:[%s1621_s3 + $0x2c8] sm:$0xff]  ;;  %v263_v24 = vld [vmem:[%s1621_s3 + $0x3c0] sm:$0xff] }
  0x24   :  { %958 = vmatpush3.bf16.msra.mxu1 %v957_v38  ;;  %960 = vmatprep.subr.bf16.mxu0 %v959_v39  ;;  %v973_v26 = vpack.c.bf16 %v214_v18, %v213_v17  ;;  %v247_v32 = vld [vmem:[%s1621_s3 + $0x340] sm:$0xff]  ;;  %v248_v33 = vld [vmem:[%s1621_s3 + $0x348] sm:$0xff]  ;;  %v237_v7 = vld [vmem:[%s1621_s3 + $0x2f0] sm:$0xff] }
  0x25   :  { %992 = vmatprep.subr.bf16.mxu1 %v991_v40  ;;  %v238_v50 = vld [vmem:[%s1621_s3 + $0x2f8] sm:$0xff]  ;;  %v221_v17 = vld [vmem:[%s1621_s3 + $0x270] sm:$0xff] }
  0x81   :  { %v1370_v19 = vpop.permute.xlu0 %101 }
  0x82   :  { %v110_v27 = vmul.f32 %v1370_v19, %v84_v59  ;;  %v112_v28 = vmul.f32 %v1370_v19, %v86_v6  ;;  %v109_v29 = vmul.f32 %v1370_v19, %v83_v58  ;;  %v111_v30 = vmul.f32 %v1370_v19, %v85_v5  ;;  %v260_v58 = vld [vmem:[%s1621_s3 + $0x3a8] sm:$0xff] }
  0x83   :  { %v212_v5 = vld [vmem:[%s1621_s3 + $0x228] sm:$0xff] }
  0x84   :  { %v126_v38 = vadd.f32 %v110_v27, %v68_v48  ;;  %v128_v39 = vadd.f32 %v112_v28, %v70_v54  ;;  %v125_v40 = vadd.f32 %v109_v29, %v67_v47  ;;  %v127_v41 = vadd.f32 %v111_v30, %v69_v53  ;;  %v227_v48 = vld [vmem:[%s1621_s3 + $0x2a0] sm:$0xff]  ;;  %v216_v29 = vld [vmem:[%s1621_s3 + $0x248] sm:$0xff] }
  0x85   :  { %v1400_v42 = vpop.permute.xlu0 %106  ;;  %v114_v53 = vmul.f32 %v1370_v19, %v88_v36  ;;  %v116_v54 = vmul.f32 %v1370_v19, %v90_v37  ;;  %v969_v14 = vpack.c.bf16 %v212_v5, %v211_v3  ;;  %v215_v28 = vld [vmem:[%s1621_s3 + $0x240] sm:$0xff]  ;;  %v265_v36 = vld [vmem:[%s1621_s3 + $0x3d0] sm:$0xff]  ;;  %v266_v37 = vld [vmem:[%s1621_s3 + $0x3d8] sm:$0xff] }
  0x86   :  { %335 = vmatprep.mubr.f32.mxu0 %v126_v38  ;;  %410 = vmatprep.mubr.f32.mxu1 %v128_v39  ;;  %v118_v49 = vmul.f32 %v1400_v42, %v92_v21  ;;  %v120_v51 = vmul.f32 %v1400_v42, %v94_v22  ;;  %v117_v52 = vmul.f32 %v1400_v42, %v91_v25  ;;  %v231_v22 = vld [vmem:[%s1621_s3 + $0x2c0] sm:$0xff]  ;;  %v264_v25 = vld [vmem:[%s1621_s3 + $0x3c8] sm:$0xff] }
  0x87   :  { %336 = vmatmul.mubr.f32.vlgmr.msra.gmra.mrb[0].mxu0 %v125_v40  ;;  %411 = vmatmul.mubr.f32.vlgmr.msra.gmra.mrb[0].mxu1 %v127_v41  ;;  %v119_v47 = vmul.f32 %v1400_v42, %v93_v35  ;;  %v130_v11 = vadd.f32 %v114_v53, %v72_v13  ;;  %v132_v12 = vadd.f32 %v116_v54, %v74_v15  ;;  %v245_v13 = vld [vmem:[%s1621_s3 + $0x330] sm:$0xff]  ;;  %v246_v15 = vld [vmem:[%s1621_s3 + $0x338] sm:$0xff]  ;;  %v47_v53 = vunpack.c.l.bf16 %v1327_v57  ;;  %v251_v5 = vld [vmem:[%s1621_s3 + $0x360] sm:$0xff] }
  0x88   :  { %962 = vmatpush3.bf16.msra.mxu0 %v961_v20  ;;  %994 = vmatpush3.bf16.msra.mxu1 %v993_v34  ;;  %v134_v59 = vadd.f32 %v118_v49, %v76_v61  ;;  %v136_v60 = vadd.f32 %v120_v51, %v78_v2  ;;  %v133_v1 = vadd.f32 %v117_v52, %v75_v4  ;;  %v229_v61 = vld [vmem:[%s1621_s3 + $0x2b0] sm:$0xff]  ;;  %v234_v35 = vld [vmem:[%s1621_s3 + $0x2d8] sm:$0xff]  ;;  %v235_v49 = vld [vmem:[%s1621_s3 + $0x2e0] sm:$0xff]  ;;  %v71_v54 = vunpack.c.l.bf16 %v1333_v62 }
  0x89   :  { %964 = vmatprep.subr.bf16.mxu0 %v963_v43  ;;  %996 = vmatprep.subr.bf16.mxu1 %v995_v44  ;;  %v135_v6 = vadd.f32 %v119_v47, %v77_v10  ;;  %v967_v2 = vpack.c.bf16 %v228_v55, %v227_v48  ;;  %v999_v4 = vpack.c.bf16 %v260_v58, %v259_v56  ;;  %v262_v10 = vld [vmem:[%s1621_s3 + $0x3b8] sm:$0xff]  ;;  %v233_v34 = vld [vmem:[%s1621_s3 + $0x2d0] sm:$0xff]  ;;  %v236_v51 = vld [vmem:[%s1621_s3 + $0x2e8] sm:$0xff]  ;;  %v49_v55 = vunpack.c.l.bf16 %v1338_v63 }
  0x8a   :  { %340 = vmatprep.mubr.f32.mxu0 %v134_v59  ;;  %415 = vmatprep.mubr.f32.mxu1 %v136_v60  ;;  %v971_v20 = vpack.c.bf16 %v230_v8, %v229_v61  ;;  %v1003_v21 = vpack.c.bf16 %v262_v10, %v261_v9  ;;  %v1005_v27 = vpack.c.bf16 %v246_v15, %v245_v13  ;;  %v217_v40 = vld [vmem:[%s1621_s3 + $0x250] sm:$0xff]  ;;  %v218_v41 = vld [vmem:[%s1621_s3 + $0x258] sm:$0xff]  ;;  %v267_v52 = vld [vmem:[%s1621_s3 + $0x3e0] sm:$0xff]  ;;  %v73_v56 = vunpack.c.l.bf16 %v1343_v0 }
  0x8b   :  { %341 = vmatmul.mubr.f32.gmra.mrb[2].mxu0 %v133_v1  ;;  %416 = vmatmul.mubr.f32.gmra.mrb[2].mxu1 %v135_v6  ;;  %v975_v30 = vpack.c.bf16 %v232_v23, %v231_v22  ;;  %v1007_v31 = vpack.c.bf16 %v264_v25, %v263_v24  ;;  %v977_v38 = vpack.c.bf16 %v216_v29, %v215_v28  ;;  %v249_v43 = vld [vmem:[%s1621_s3 + $0x350] sm:$0xff]  ;;  %v268_v48 = vld [vmem:[%s1621_s3 + $0x3e8] sm:$0xff]  ;;  %v42_v59 = vld [vmem:[%s1622_s1 + $0x38] sm:$0xff] }
  0x8c   :  { %966 = vmatpush3.bf16.msra.mxu0 %v965_v45  ;;  %998 = vmatpush3.bf16.msra.mxu1 %v997_v46  ;;  %v1009_v39 = vpack.c.bf16 %v248_v33, %v247_v32  ;;  %v979_v44 = vpack.c.bf16 %v234_v35, %v233_v34  ;;  %v1011_v45 = vpack.c.bf16 %v266_v37, %v265_v36  ;;  %v250_v46 = vld [vmem:[%s1621_s3 + $0x358] sm:$0xff]  ;;  %v41_v47 = vld [vmem:[%s1622_s1 + $0x30] sm:$0xff]  ;;  %v219_v63 = vld [vmem:[%s1621_s3 + $0x260] sm:$0xff]  ;;  %v58_v9 = vunpack.c.h.bf16 %v42_v59 }
  0x8d   :  { %485 = vmatprep.mubr.f32.mxu0 %v130_v11  ;;  %560 = vmatprep.mubr.f32.mxu1 %v132_v12  ;;  %v1532_v58 = vld [vmem:[%s1623_s2 + $0x30] sm:$0xff]  ;;  %v1540_v60 = vld [vmem:[%s1623_s2 + $0x38] sm:$0xff]  ;;  %v981_v57 = vpack.c.bf16 %v218_v41, %v217_v40  ;;  %v1013_v62 = vpack.c.bf16 %v250_v46, %v249_v43  ;;  %v220_v0 = vld [vmem:[%s1621_s3 + $0x268] sm:$0xff]  ;;  %v983_v1 = vpack.c.bf16 %v236_v51, %v235_v49  ;;  %v55_v18 = vunpack.c.l.bf16 %v41_v47 }
  0x8e   :  { %968 = vmatprep.subr.bf16.mxu0 %v967_v2  ;;  %1000 = vmatprep.subr.bf16.mxu1 %v999_v4  ;;  %v1015_v3 = vpack.c.bf16 %v268_v48, %v267_v52  ;;  %v252_v6 = vld [vmem:[%s1621_s3 + $0x368] sm:$0xff]  ;;  %v269_v61 = vld [vmem:[%s1621_s3 + $0x3f0] sm:$0xff]  ;;  %v270_v2 = vld [vmem:[%s1621_s3 + $0x3f8] sm:$0xff]  ;;  %v56_v4 = vunpack.c.h.bf16 %v41_v47  ;;  %v80_v8 = vunpack.c.h.bf16 %v1532_v58  ;;  %v82_v10 = vunpack.c.h.bf16 %v1540_v60 }
  0x8f   :  { %v87_v11 = vsub.f32 %v47_v53, %v71_v54  ;;  %v89_v12 = vsub.f32 %v49_v55, %v73_v56  ;;  %v1019_v13 = vpack.c.bf16 %v270_v2, %v269_v61  ;;  %v222_v15 = vld [vmem:[%s1621_s3 + $0x278] sm:$0xff]  ;;  %v253_v22 = vld [vmem:[%s1621_s3 + $0x370] sm:$0xff]  ;;  %v57_v24 = vunpack.c.l.bf16 %v42_v59 }
  0x90   :  { %970 = vmatpush3.bf16.msra.mxu0 %v969_v14  ;;  %1002 = vmatpush3.bf16.msra.mxu1 %v1001_v16  ;;  %v985_v14 = vpack.c.bf16 %v220_v0, %v219_v63  ;;  %v1017_v16 = vpack.c.bf16 %v252_v6, %v251_v5  ;;  %v254_v23 = vld [vmem:[%s1621_s3 + $0x378] sm:$0xff]  ;;  %v81_v25 = vunpack.c.l.bf16 %v1540_v60  ;;  %v989_v28 = vpack.c.bf16 %v222_v15, %v221_v17  ;;  %v605_v46 = vld [vmem:[%s1624_s6 + $0x10] sm:$0xff]  ;;  %v720_v15 = vld [vmem:[%s1625_s4] ss:$0 sm:$0xff] }
  0x91   :  { %972 = vmatprep.subr.bf16.mxu0 %v971_v20  ;;  %1004 = vmatprep.subr.bf16.mxu1 %v1003_v21  ;;  %v79_v20 = vunpack.c.l.bf16 %v1532_v58  ;;  %v987_v21 = vpack.c.bf16 %v238_v50, %v237_v7  ;;  %v1021_v29 = vpack.c.bf16 %v254_v23, %v253_v22  ;;  %v115_v32 = vmul.f32 %v1370_v19, %v89_v12  ;;  %v606_v51 = vld [vmem:[%s1624_s6 + $0x18] sm:$0xff] }
  0x92   :  { %v97_v33 = vsub.f32 %v57_v24, %v81_v25  ;;  %v1027_v52 = vpack.c.bf16 %v606_v51, %v605_v46  ;;  %v721_v24 = vld [vmem:[%s1626_s5] ss:$0 sm:$0xff] }
  0x93   :  { %v131_v37 = vadd.f32 %v115_v32, %v73_v56 }
  0x94   :  { %974 = vmatpush3.bf16.msra.mxu0 %v973_v26  ;;  %1006 = vmatpush3.bf16.msra.mxu1 %v1005_v27  ;;  %v96_v26 = vsub.f32 %v56_v4, %v80_v8  ;;  %v98_v27 = vsub.f32 %v58_v9, %v82_v10 }
  0x95   :  { %976 = vmatprep.subr.bf16.mxu0 %v975_v30  ;;  %1008 = vmatprep.subr.bf16.mxu1 %v1007_v31  ;;  %v95_v30 = vsub.f32 %v55_v18, %v79_v20  ;;  %v113_v31 = vmul.f32 %v1370_v19, %v87_v11 }
  0x96   :  { %v122_v34 = vmul.f32 %v1400_v42, %v96_v26  ;;  %v124_v35 = vmul.f32 %v1400_v42, %v98_v27  ;;  %v1041_v26 = vmov 0.2  }
  0x97   :  { %v129_v36 = vadd.f32 %v113_v31, %v71_v54 }
  0x98   :  { %978 = vmatpush3.bf16.msra.mxu0 %v977_v38  ;;  %1010 = vmatpush3.bf16.msra.mxu1 %v1009_v39  ;;  %v121_v38 = vmul.f32 %v1400_v42, %v95_v30  ;;  %v123_v39 = vmul.f32 %v1400_v42, %v97_v33  ;;  %v138_v40 = vadd.f32 %v122_v34, %v80_v8  ;;  %v603_v42 = vld [vmem:[%s1624_s6] sm:$0xff] }
  0x99   :  { %980 = vmatprep.subr.bf16.mxu0 %v979_v44  ;;  %1012 = vmatprep.subr.bf16.mxu1 %v1011_v45  ;;  %v140_v41 = vadd.f32 %v124_v35, %v82_v10  ;;  %v1040_v44 = vmov 0.0   ;;  %v604_v45 = vld [vmem:[%s1624_s6 + $0x8] sm:$0xff] }
  0x9a   :  { %v137_v19 = vadd.f32 %v121_v38, %v79_v20  ;;  %v139_v43 = vadd.f32 %v123_v39, %v81_v25  ;;  %31 = vst.msk [vmem:[#allocation2] sm:$0xff] %vm30_vm0, %v1040_v44  ;;  %32 = vst.msk [vmem:[#allocation2 + $0x8] sm:$0xff] %vm30_vm0, %v1040_v44  ;;  %v1023_v49 = vpack.c.bf16 %v604_v45, %v603_v42 }
  0x9c   :  { %982 = vmatpush3.bf16.msra.mxu0 %v981_v57  ;;  %1014 = vmatpush3.bf16.msra.mxu1 %v1013_v62 }
  0x9d   :  { %984 = vmatprep.subr.bf16.mxu0 %v983_v1  ;;  %1016 = vmatprep.subr.bf16.mxu1 %v1015_v3 }
  0xa0   :  { %986 = vmatpush3.bf16.msra.mxu0 %v985_v14  ;;  %1018 = vmatpush3.bf16.msra.mxu1 %v1017_v16 }
  0xa1   :  { %988 = vmatprep.subr.bf16.mxu0 %v987_v21  ;;  %1020 = vmatprep.subr.bf16.mxu1 %v1019_v13  ;;  %v141_v9 = vld [vmem:[#allocation2] sm:$0xff]  ;;  %v142_v20 = vld [vmem:[#allocation2 + $0x8] sm:$0xff] }
  0xa4   :  { %990 = vmatpush3.bf16.msra.mxu0 %v989_v28  ;;  %1022 = vmatpush3.bf16.msra.mxu1 %v1021_v29 }
  0xa5   :  { %1024 = vmatprep.subr.bf16.mxu0 %v1023_v49 }
  0xa7   :  { %486 = vmatmul.mubr.f32.vlgmr.msra.gmra.mrb[4].mxu0 %v129_v36  ;;  %561 = vmatmul.mubr.f32.vlgmr.msra.gmra.mrb[4].mxu1 %v131_v37 }
  0xa8   :  { %490 = vmatprep.mubr.f32.mxu0 %v138_v40  ;;  %565 = vmatprep.mubr.f32.mxu1 %v140_v41 }
  0xa9   :  { %1026 = vmatpush3.bf16.msra.mxu0 %v1023_v49 }
  0xaa   :  { %1028 = vmatprep.subr.bf16.mxu0 %v1027_v52 }
  0xab   :  { %491 = vmatmul.mubr.f32.gmra.mrb[6].mxu0 %v137_v19  ;;  %566 = vmatmul.mubr.f32.gmra.mrb[6].mxu1 %v139_v43 }
  0xad   :  { %1030 = vmatpush3.bf16.msra.mxu0 %v1027_v52 }
 0x15a   :  { %v758_v48 = vpop.f32.mrb[0].mxu0  ;;  %v796_v47 = vpop.f32.mrb[0].mxu1 }
 0x15b   :  { %v759_v53 = vpop.f32.mrb[1].mxu0  ;;  %v797_v54 = vpop.f32.mrb[1].mxu1 }
 0x15c   :  { %v760_v55 = vadd.f32 %v759_v53, %v758_v48  ;;  %v798_v56 = vadd.f32 %v797_v54, %v796_v47 }
 0x15e   :  { %v413_v58 = vadd.f32 %v798_v56, %v760_v55  ;;  %v761_v59 = vpop.f32.mrb[2].mxu0  ;;  %v799_v60 = vpop.f32.mrb[2].mxu1 }
 0x15f   :  { %v762_v57 = vpop.f32.mrb[3].mxu0  ;;  %v800_v62 = vpop.f32.mrb[3].mxu1 }
 0x160   :  { %v763_v63 = vadd.f32 %v762_v57, %v761_v59  ;;  %v801_v0 = vadd.f32 %v800_v62, %v799_v60 }
 0x162   :  { %v418_v1 = vadd.f32 %v801_v0, %v763_v63 }
 0x17a   :  { %v834_v3 = vpop.f32.mrb[4].mxu0  ;;  %v872_v5 = vpop.f32.mrb[4].mxu1 }
 0x17b   :  { %v835_v6 = vpop.f32.mrb[5].mxu0  ;;  %v873_v7 = vpop.f32.mrb[5].mxu1 }
 0x17c   :  { %v836_v50 = vadd.f32 %v835_v6, %v834_v3  ;;  %v874_v61 = vadd.f32 %v873_v7, %v872_v5 }
 0x17e   :  { %v488_v2 = vadd.f32 %v836_v50, %v413_v58  ;;  %v837_v4 = vpop.f32.mrb[6].mxu0  ;;  %v875_v8 = vpop.f32.mrb[6].mxu1 }
 0x17f   :  { %v838_v10 = vpop.f32.mrb[7].mxu0  ;;  %v876_v11 = vpop.f32.mrb[7].mxu1 }
 0x180   :  { %v563_v12 = vadd.f32 %v874_v61, %v488_v2  ;;  %v839_v14 = vadd.f32 %v838_v10, %v837_v4  ;;  %v877_v16 = vadd.f32 %v876_v11, %v875_v8 }
 0x182   :  { %v571_v17 = vadd.f32 %v563_v12, %v141_v9  ;;  %v493_v18 = vadd.f32 %v839_v14, %v418_v1 }
 0x184   :  { %574 = vst.msk [vmem:[#allocation2] sm:$0xff] %vm30_vm0, %v571_v17  ;;  %v568_v21 = vadd.f32 %v877_v16, %v493_v18 }
 0x186   :  { %v572_v13 = vadd.f32 %v568_v21, %v142_v20 }
 0x188   :  { %575 = vst.msk [vmem:[#allocation2 + $0x8] sm:$0xff] %vm30_vm0, %v572_v13 }
 0x18b   :  { %v579_v22 = vld [vmem:[#allocation2] sm:$0xff] }
 0x18c   :  { %v588_v23 = vadd.f32 %v720_v15, %v579_v22 }
 0x18e   :  { %vm590_vm1 = vcmp.gt.f32.partialorder %v588_v23, 0.0 }
 0x18f   :  { %v580_v25 = vld [vmem:[#allocation2 + $0x8] sm:$0xff]  ;;  %v592_v27 = vsel %vm590_vm1, 1.0, %v1041_v26 }
 0x190   :  { %v589_v28 = vadd.f32 %v720_v15, %v580_v25  ;;  %v601_v29 = vmul.f32 %v721_v24, %v592_v27 }
 0x192   :  { %vm591_vm2 = vcmp.gt.f32.partialorder %v589_v28, 0.0  ;;  %892 = vmatprep.mubr.msk.f32.mxu0 %vm30_vm0, %v601_v29 }
 0x193   :  { %v593_v30 = vsel %vm591_vm2, 1.0, %v1041_v26 }
 0x194   :  { %v602_v31 = vmul.f32 %v721_v24, %v593_v30 }
 0x196   :  { %893 = vmatmul.mubr.msk.f32.vlgmr.msra.gmra.mrb[8].mxu0 %vm30_vm0, %v602_v31 }
 0x269   :  { %v894_v32 = vpop.f32.mrb[8].mxu0 }
 0x26a   :  { %v679_v33 = vpop.f32.mrb[9].mxu0  ;;  %v689_v35 = vmul.f32 %v894_v32, %v602_v31 }
 0x26b   :  { %v688_v34 = vmul.f32 %v679_v33, %v601_v29 }
 0x26c   :  { %v693_v37 = vsel %vm30_vm0, %v689_v35, 0.0 }
 0x26d   :  { %v690_v36 = vsel %vm30_vm0, %v688_v34, 0.0 }
 0x26e   :  { %691 = vadd.xlane.f32.xlu1 %v690_v36 }
 0x272   :  { %694 = vadd.xlane.f32.xlu1 %v693_v37 }
 0x2fb   :  { %v692_v38 = vpop.xlane.xlu1 %691 }
 0x2fc   :  { %1035 = vrsqrt.f32 %v692_v38  ;;  %vm698_vm3 = vcmp.eq.f32.partialorder %v692_v38, inf  ;;  %v701_v19 = vand.u32 2147483648, %v692_v38  ;;  %vm700_vm4 = vcmp.eq.f32.partialorder %v692_v38, 0.0 }
 0x2ff   :  { %v695_v39 = vpop.xlane.xlu1 %694 }
 0x300   :  { %1037 = vrsqrt.f32 %v695_v39  ;;  %vm705_vm5 = vcmp.eq.f32.partialorder %v695_v39, inf  ;;  %v708_v49 = vand.u32 2147483648, %v695_v39  ;;  %vm707_vm6 = vcmp.eq.f32.partialorder %v695_v39, 0.0 }
 0x306   :  { %v1036_v40 = vpop.eup %1035 }
 0x307   :  { %v697_v41 = vmul.f32 %v1036_v40, %v692_v38 }
 0x309   :  { %v699_v43 = vsel %vm698_vm3, %v692_v38, %v697_v41 }
 0x30a   :  { %v1038_v44 = vpop.eup %1037  ;;  %v702_v42 = vsel %vm700_vm4, %v701_v19, %v699_v43 }
 0x30b   :  { %v724_v45 = vadd.f32 -1.0, %v702_v42  ;;  %v704_v46 = vmul.f32 %v1038_v44, %v695_v39 }
 0x30d   :  { %v712_v51 = vmul.f32 %v724_v45, %v724_v45  ;;  %v706_v52 = vsel %vm705_vm5, %v695_v39, %v704_v46 }
 0x30e   :  { %v709_v48 = vsel %vm707_vm6, %v708_v49, %v706_v52 }
 0x30f   :  { %714 = vst [vmem:[%s1627_s7] sm:$0xff] %v712_v51  ;;  %v725_v47 = vadd.f32 -1.0, %v709_v48 }
 0x311   :  { %v713_v53 = vmul.f32 %v725_v47, %v725_v47 }
 0x313   :  { %715 = vst [vmem:[%s1627_s7 + $0x8] sm:$0xff] %v713_v53 }

</bundles_post_ra>
